<compile_context>
chip_gen: v5e
topology: v5e:2x2
jax: 0.10.0
libtpu: 0.0.40
codegen_flags: <defaults>
</compile_context>

<pallas_src>
import functools
import math

import jax
import jax.numpy as jnp
from jax import lax
from jax.experimental import pallas as pl
from jax.experimental.pallas import tpu as pltpu


def _transformer_layer_kernel(x_ref, wqkv_ref, bqkv_ref, wo_ref, bo_ref,
                              wmlp_ref, o_ref, *, num_heads):
    """One batch element per grid step.

    x_ref:    (L, C)    this batch element's sequence (lane-dense C)
    wqkv_ref: (C, 3C)   bf16, folded [q|k|v] projection (right-multiplied)
    bqkv_ref: (1, 3C)   f32 in_proj bias (query third pre-scaled by 1/sqrt(D))
    wo_ref:   (C, C)    bf16, out_proj.weight^T
    bo_ref:   (1, C)    f32, out_proj bias
    wmlp_ref: (C, C)    bf16, (Wfc2 @ Wfc1)^T
    o_ref:    (L, C)
    """
    C = x_ref.shape[-1]
    D = C // num_heads

    x_f32 = x_ref[...].astype(jnp.float32)            # residual path (f32, VPU)
    x_bf = x_f32.astype(jnp.bfloat16)                  # MXU operand

    # Fused q/k/v projection: one bf16 MXU matmul, f32 accumulation, f32 bias.
    qkv = (jnp.dot(x_bf, wqkv_ref[...], preferred_element_type=jnp.float32)
           + bqkv_ref[...])                            # (L, 3C) f32

    wo = wo_ref[...]                                   # (C, C) bf16, loaded once

    # Output-projection accumulator: residual + bias first, heads added below.
    y = x_f32 + bo_ref[...]                            # (L, C) f32

    qkt_dims = (((1,), (1,)), ((), ()))                # q @ k^T
    for h in range(num_heads):
        q_h = qkv[:, h * D:(h + 1) * D]                # 1/sqrt(D) already folded
        k_h = qkv[:, C + h * D:C + (h + 1) * D]
        v_h = qkv[:, 2 * C + h * D:2 * C + (h + 1) * D]

        s = lax.dot_general(q_h.astype(jnp.bfloat16), k_h.astype(jnp.bfloat16),
                            qkt_dims, preferred_element_type=jnp.float32)  # (L, L)
        s = s - jnp.max(s, axis=-1, keepdims=True)
        p = jnp.exp(s)
        p = p * pl.reciprocal(jnp.sum(p, axis=-1, keepdims=True), approx=True)

        o_h = jnp.dot(p.astype(jnp.bfloat16), v_h.astype(jnp.bfloat16),
                      preferred_element_type=jnp.float32)                  # (L, D)
        # Accumulate this head directly into the output projection (no lane
        # concatenate of (L, D) pieces).
        y = y + jnp.dot(o_h.astype(jnp.bfloat16), wo[h * D:(h + 1) * D, :],
                        preferred_element_type=jnp.float32)

    # fc2(fc1(y)) folded into a single matrix, plus residual.
    out = y + jnp.dot(y.astype(jnp.bfloat16), wmlp_ref[...],
                      preferred_element_type=jnp.float32)

    o_ref[...] = out.astype(o_ref.dtype)


def transformer_layer(x_lnc, wq, wk, wv, w_in, b_in, wo, bo, wfc1, wfc2,
                      *, num_heads):
    """Equivalent of TransformerLayer(c, num_heads).forward(x), x: (L, N, C)."""
    L, N, C = x_lnc.shape
    assert C % num_heads == 0
    # The batch axis is addressed as C-wide lane blocks of the (L, N*C) view.
    assert C % 128 == 0 or N == 1, "lane blocking requires C % 128 == 0"

    f32, bf16 = jnp.float32, jnp.bfloat16
    D = C // num_heads
    scale = 1.0 / math.sqrt(D)

    # nn.MultiheadAttention packs in_proj as [Wq_in; Wk_in; Wv_in] (3C, C) + (3C,).
    wiq, wik, wiv = w_in[0:C], w_in[C:2 * C], w_in[2 * C:3 * C]
    biq, bik, biv = b_in[0:C], b_in[C:2 * C], b_in[2 * C:3 * C]

    # Fold the external q/k/v Linear into the in-projection (f32 fold, then one
    # bf16 cast), fold 1/sqrt(D) into the query weight/bias, and pack [q|k|v]
    # side by side for a single fused projection matmul.
    wq_eff = jnp.transpose(wiq.astype(f32) @ wq.astype(f32)) * scale
    wk_eff = jnp.transpose(wik.astype(f32) @ wk.astype(f32))
    wv_eff = jnp.transpose(wiv.astype(f32) @ wv.astype(f32))
    w_qkv = jnp.concatenate([wq_eff, wk_eff, wv_eff], axis=1).astype(bf16)  # (C, 3C)
    b_qkv = jnp.concatenate([biq.astype(f32) * scale, bik.astype(f32),
                             biv.astype(f32)]).reshape(1, 3 * C)

    wo_t = jnp.transpose(wo.astype(f32)).astype(bf16)                       # (C, C)
    bo_r = bo.astype(f32).reshape(1, C)
    # fc2(fc1(x)) == x @ (Wfc2 @ Wfc1).T  (both Linears are bias-free).
    wmlp = jnp.transpose(wfc2.astype(f32) @ wfc1.astype(f32)).astype(bf16)

    # (L, N, C) -> (L, N*C): row-major collapse of trailing dims (pure bitcast,
    # no transpose / HBM round trip).  Batch n occupies lane columns
    # [n*C, (n+1)*C), so BlockSpec (L, C) with block index (0, n) selects it.
    x2 = x_lnc.reshape(L, N * C)

    kernel = functools.partial(_transformer_layer_kernel, num_heads=num_heads)
    const2d = lambda b: (0, 0)

    out2 = pl.pallas_call(
        kernel,
        out_shape=jax.ShapeDtypeStruct((L, N * C), x_lnc.dtype),
        grid_spec=pltpu.PrefetchScalarGridSpec(
            num_scalar_prefetch=0,
            grid=(N,),
            in_specs=[
                pl.BlockSpec((L, C), lambda b: (0, b)),       # x, one batch/step
                pl.BlockSpec((C, 3 * C), const2d),            # fused qkv weight
                pl.BlockSpec((1, 3 * C), const2d),            # fused qkv bias
                pl.BlockSpec((C, C), const2d),                # wo^T
                pl.BlockSpec((1, C), const2d),                # bo
                pl.BlockSpec((C, C), const2d),                # folded MLP weight
            ],
            out_specs=pl.BlockSpec((L, C), lambda b: (0, b)),
        ),
        compiler_params=pltpu.CompilerParams(
            dimension_semantics=("parallel",),
            vmem_limit_bytes=32 * 1024 * 1024),
    )(x2, w_qkv, b_qkv, wo_t, bo_r, wmlp)

    return out2.reshape(L, N, C)


def _reference(x, wq, wk, wv, w_in, b_in, wo, bo, wfc1, wfc2, num_heads):
    """Pure-JAX replica of the PyTorch forward (unfused f32 weights)."""
    L, N, C = x.shape
    D = C // num_heads
    hp = lax.Precision.HIGHEST

    q0 = jnp.matmul(x, wq.T, precision=hp)
    k0 = jnp.matmul(x, wk.T, precision=hp)
    v0 = jnp.matmul(x, wv.T, precision=hp)

    wiq, wik, wiv = w_in[0:C], w_in[C:2 * C], w_in[2 * C:3 * C]
    biq, bik, biv = b_in[0:C], b_in[C:2 * C], b_in[2 * C:3 * C]
    q = jnp.matmul(q0, wiq.T, precision=hp) + biq
    k = jnp.matmul(k0, wik.T, precision=hp) + bik
    v = jnp.matmul(v0, wiv.T, precision=hp) + biv

    # (L, N, C) -> (N*H, L, D)  (PyTorch multi_head_attention_forward layout).
    q = q.reshape(L, N * num_heads, D).transpose(1, 0, 2) / math.sqrt(D)
    k = k.reshape(L, N * num_heads, D).transpose(1, 0, 2)
    v = v.reshape(L, N * num_heads, D).transpose(1, 0, 2)
    s = jnp.einsum("bld,bmd->blm", q, k, precision=hp)
    p = jax.nn.softmax(s, axis=-1)
    o = jnp.einsum("blm,bmd->bld", p, v, precision=hp)
    o = o.transpose(1, 0, 2).reshape(L, N, C)
    attn = jnp.matmul(o, wo.T, precision=hp) + bo

    x1 = attn + x
    x2 = jnp.matmul(jnp.matmul(x1, wfc1.T, precision=hp), wfc2.T,
                    precision=hp) + x1
    return x2


if __name__ == "__main__":
    # TransformerLayer(c=128, num_heads=4) on x of shape (L=16, N=2, C=128).
    # (C=128 keeps the lane axis fully dense; head_dim = 32.)
    L, N, C, H = 16, 2, 128, 4

    key = jax.random.PRNGKey(0)
    ks = jax.random.split(key, 10)
    std = 1.0 / math.sqrt(C)

    x = jax.random.normal(ks[0], (L, N, C), dtype=jnp.float32)
    wq = std * jax.random.normal(ks[1], (C, C), dtype=jnp.float32)
    wk = std * jax.random.normal(ks[2], (C, C), dtype=jnp.float32)
    wv = std * jax.random.normal(ks[3], (C, C), dtype=jnp.float32)
    w_in = std * jax.random.normal(ks[4], (3 * C, C), dtype=jnp.float32)
    b_in = 0.1 * jax.random.normal(ks[5], (3 * C,), dtype=jnp.float32)
    wo = std * jax.random.normal(ks[6], (C, C), dtype=jnp.float32)
    bo = 0.1 * jax.random.normal(ks[7], (C,), dtype=jnp.float32)
    wfc1 = std * jax.random.normal(ks[8], (C, C), dtype=jnp.float32)
    wfc2 = std * jax.random.normal(ks[9], (C, C), dtype=jnp.float32)

    out = transformer_layer(x, wq, wk, wv, w_in, b_in, wo, bo, wfc1, wfc2,
                            num_heads=H)
    out = jax.block_until_ready(out)

    ref = _reference(x, wq, wk, wv, w_in, b_in, wo, bo, wfc1, wfc2, H)
    assert out.shape == (L, N, C), out.shape
    max_err = float(jnp.max(jnp.abs(out - ref)))
    # bf16 MXU operands + folded weights + approx reciprocal vs. an f32-HIGHEST
    # reference: allow a bf16-appropriate tolerance.
    assert jnp.allclose(out, ref, atol=5e-2, rtol=5e-2), max_err

    print("KERNEL_OK")
</pallas_src>

<mosaic_0001>
module attributes {stable_mosaic.version = 11 : i64} {
  func.func @_transformer_layer_kernel(%arg0: i32, %arg1: memref<16x128xf32, #tpu.memory_space<vmem>>, %arg2: memref<128x384xbf16, #tpu.memory_space<vmem>>, %arg3: memref<1x384xf32, #tpu.memory_space<vmem>>, %arg4: memref<128x128xbf16, #tpu.memory_space<vmem>>, %arg5: memref<1x128xf32, #tpu.memory_space<vmem>>, %arg6: memref<128x128xbf16, #tpu.memory_space<vmem>>, %arg7: memref<16x128xf32, #tpu.memory_space<vmem>>) attributes {dimension_semantics = [#tpu.dimension_semantics<parallel>], iteration_bounds = array<i64: 2>, scalar_prefetch = 0 : i64, scratch_operands = 0 : i64, tpu.core_type = #tpu.core_type<tc>, window_params = [{transform_indices = @transform_0, window_bounds = array<i64: 16, 128>}, {pipeline_mode = #tpu.pipeline_mode<synchronous>, transform_indices = @transform_1, window_bounds = array<i64: 128, 384>}, {pipeline_mode = #tpu.pipeline_mode<synchronous>, transform_indices = @transform_2, window_bounds = array<i64: 1, 384>}, {pipeline_mode = #tpu.pipeline_mode<synchronous>, transform_indices = @transform_3, window_bounds = array<i64: 128, 128>}, {pipeline_mode = #tpu.pipeline_mode<synchronous>, transform_indices = @transform_4, window_bounds = array<i64: 1, 128>}, {pipeline_mode = #tpu.pipeline_mode<synchronous>, transform_indices = @transform_5, window_bounds = array<i64: 128, 128>}, {transform_indices = @transform_6, window_bounds = array<i64: 16, 128>}]} {
    %c0 = arith.constant 0 : index
    %c0_0 = arith.constant 0 : index
    %0 = vector.load %arg1[%c0, %c0_0] : memref<16x128xf32, #tpu.memory_space<vmem>>, vector<16x128xf32>
    %1 = arith.truncf %0 : vector<16x128xf32> to vector<16x128xbf16>
    %c0_1 = arith.constant 0 : index
    %c0_2 = arith.constant 0 : index
    %2 = vector.load %arg2[%c0_1, %c0_2] : memref<128x384xbf16, #tpu.memory_space<vmem>>, vector<128x384xbf16>
    %cst = arith.constant dense<0.000000e+00> : vector<16x384xf32>
    %3 = tpu.matmul %1, %2, %cst {dimension_numbers = #tpu.dot_dimension_numbers<[1], [0], [0], [1], [0, 0, 1, 1], [], []>} : vector<16x128xbf16>, vector<128x384xbf16>, vector<16x384xf32> -> vector<16x384xf32>
    %c0_3 = arith.constant 0 : index
    %c0_4 = arith.constant 0 : index
    %4 = vector.load %arg3[%c0_3, %c0_4] : memref<1x384xf32, #tpu.memory_space<vmem>>, vector<1x384xf32>
    %5 = vector.broadcast %4 : vector<1x384xf32> to vector<16x384xf32>
    %6 = arith.addf %3, %5 : vector<16x384xf32>
    %c0_5 = arith.constant 0 : index
    %c0_6 = arith.constant 0 : index
    %7 = vector.load %arg4[%c0_5, %c0_6] : memref<128x128xbf16, #tpu.memory_space<vmem>>, vector<128x128xbf16>
    %c0_7 = arith.constant 0 : index
    %c0_8 = arith.constant 0 : index
    %8 = vector.load %arg5[%c0_7, %c0_8] : memref<1x128xf32, #tpu.memory_space<vmem>>, vector<1x128xf32>
    %9 = vector.broadcast %8 : vector<1x128xf32> to vector<16x128xf32>
    %10 = arith.addf %0, %9 : vector<16x128xf32>
    %11 = vector.extract_strided_slice %6 {offsets = [0, 0], sizes = [16, 32], strides = [1, 1]} : vector<16x384xf32> to vector<16x32xf32>
    %12 = vector.extract_strided_slice %6 {offsets = [0, 128], sizes = [16, 32], strides = [1, 1]} : vector<16x384xf32> to vector<16x32xf32>
    %13 = vector.extract_strided_slice %6 {offsets = [0, 256], sizes = [16, 32], strides = [1, 1]} : vector<16x384xf32> to vector<16x32xf32>
    %14 = arith.truncf %11 : vector<16x32xf32> to vector<16x32xbf16>
    %15 = arith.truncf %12 : vector<16x32xf32> to vector<16x32xbf16>
    %cst_9 = arith.constant dense<0.000000e+00> : vector<16x16xf32>
    %16 = tpu.matmul %14, %15, %cst_9 {dimension_numbers = #tpu.dot_dimension_numbers<[1], [1], [0], [0], [0, 0, 1, 0], [], []>} : vector<16x32xbf16>, vector<16x32xbf16>, vector<16x16xf32> -> vector<16x16xf32>
    %cst_10 = arith.constant dense<0xFF800000> : vector<16xf32>
    %17 = vector.multi_reduction <maximumf>, %16, %cst_10 [1] : vector<16x16xf32> to vector<16xf32>
    %18 = vector.shape_cast %17 : vector<16xf32> to vector<16x1xf32>
    %19 = vector.broadcast %18 : vector<16x1xf32> to vector<16x16xf32>
    %20 = arith.subf %16, %19 : vector<16x16xf32>
    %21 = math.exp %20 : vector<16x16xf32>
    %cst_11 = arith.constant dense<0.000000e+00> : vector<16xf32>
    %22 = vector.multi_reduction <add>, %21, %cst_11 [1] : vector<16x16xf32> to vector<16xf32>
    %23 = vector.shape_cast %22 : vector<16xf32> to vector<16x1xf32>
    %24 = tpu.reciprocal %23 {approx = true} : vector<16x1xf32> -> vector<16x1xf32>
    %25 = vector.broadcast %24 : vector<16x1xf32> to vector<16x16xf32>
    %26 = arith.mulf %21, %25 : vector<16x16xf32>
    %27 = arith.truncf %26 : vector<16x16xf32> to vector<16x16xbf16>
    %28 = arith.truncf %13 : vector<16x32xf32> to vector<16x32xbf16>
    %cst_12 = arith.constant dense<0.000000e+00> : vector<16x32xf32>
    %29 = tpu.matmul %27, %28, %cst_12 {dimension_numbers = #tpu.dot_dimension_numbers<[1], [0], [0], [1], [0, 0, 1, 1], [], []>} : vector<16x16xbf16>, vector<16x32xbf16>, vector<16x32xf32> -> vector<16x32xf32>
    %30 = arith.truncf %29 : vector<16x32xf32> to vector<16x32xbf16>
    %31 = vector.extract_strided_slice %7 {offsets = [0, 0], sizes = [32, 128], strides = [1, 1]} : vector<128x128xbf16> to vector<32x128xbf16>
    %cst_13 = arith.constant dense<0.000000e+00> : vector<16x128xf32>
    %32 = tpu.matmul %30, %31, %cst_13 {dimension_numbers = #tpu.dot_dimension_numbers<[1], [0], [0], [1], [0, 0, 1, 1], [], []>} : vector<16x32xbf16>, vector<32x128xbf16>, vector<16x128xf32> -> vector<16x128xf32>
    %33 = arith.addf %10, %32 : vector<16x128xf32>
    %34 = vector.extract_strided_slice %6 {offsets = [0, 32], sizes = [16, 32], strides = [1, 1]} : vector<16x384xf32> to vector<16x32xf32>
    %35 = vector.extract_strided_slice %6 {offsets = [0, 160], sizes = [16, 32], strides = [1, 1]} : vector<16x384xf32> to vector<16x32xf32>
    %36 = vector.extract_strided_slice %6 {offsets = [0, 288], sizes = [16, 32], strides = [1, 1]} : vector<16x384xf32> to vector<16x32xf32>
    %37 = arith.truncf %34 : vector<16x32xf32> to vector<16x32xbf16>
    %38 = arith.truncf %35 : vector<16x32xf32> to vector<16x32xbf16>
    %cst_14 = arith.constant dense<0.000000e+00> : vector<16x16xf32>
    %39 = tpu.matmul %37, %38, %cst_14 {dimension_numbers = #tpu.dot_dimension_numbers<[1], [1], [0], [0], [0, 0, 1, 0], [], []>} : vector<16x32xbf16>, vector<16x32xbf16>, vector<16x16xf32> -> vector<16x16xf32>
    %cst_15 = arith.constant dense<0xFF800000> : vector<16xf32>
    %40 = vector.multi_reduction <maximumf>, %39, %cst_15 [1] : vector<16x16xf32> to vector<16xf32>
    %41 = vector.shape_cast %40 : vector<16xf32> to vector<16x1xf32>
    %42 = vector.broadcast %41 : vector<16x1xf32> to vector<16x16xf32>
    %43 = arith.subf %39, %42 : vector<16x16xf32>
    %44 = math.exp %43 : vector<16x16xf32>
    %cst_16 = arith.constant dense<0.000000e+00> : vector<16xf32>
    %45 = vector.multi_reduction <add>, %44, %cst_16 [1] : vector<16x16xf32> to vector<16xf32>
    %46 = vector.shape_cast %45 : vector<16xf32> to vector<16x1xf32>
    %47 = tpu.reciprocal %46 {approx = true} : vector<16x1xf32> -> vector<16x1xf32>
    %48 = vector.broadcast %47 : vector<16x1xf32> to vector<16x16xf32>
    %49 = arith.mulf %44, %48 : vector<16x16xf32>
    %50 = arith.truncf %49 : vector<16x16xf32> to vector<16x16xbf16>
    %51 = arith.truncf %36 : vector<16x32xf32> to vector<16x32xbf16>
    %cst_17 = arith.constant dense<0.000000e+00> : vector<16x32xf32>
    %52 = tpu.matmul %50, %51, %cst_17 {dimension_numbers = #tpu.dot_dimension_numbers<[1], [0], [0], [1], [0, 0, 1, 1], [], []>} : vector<16x16xbf16>, vector<16x32xbf16>, vector<16x32xf32> -> vector<16x32xf32>
    %53 = arith.truncf %52 : vector<16x32xf32> to vector<16x32xbf16>
    %54 = vector.extract_strided_slice %7 {offsets = [32, 0], sizes = [32, 128], strides = [1, 1]} : vector<128x128xbf16> to vector<32x128xbf16>
    %cst_18 = arith.constant dense<0.000000e+00> : vector<16x128xf32>
    %55 = tpu.matmul %53, %54, %cst_18 {dimension_numbers = #tpu.dot_dimension_numbers<[1], [0], [0], [1], [0, 0, 1, 1], [], []>} : vector<16x32xbf16>, vector<32x128xbf16>, vector<16x128xf32> -> vector<16x128xf32>
    %56 = arith.addf %33, %55 : vector<16x128xf32>
    %57 = vector.extract_strided_slice %6 {offsets = [0, 64], sizes = [16, 32], strides = [1, 1]} : vector<16x384xf32> to vector<16x32xf32>
    %58 = vector.extract_strided_slice %6 {offsets = [0, 192], sizes = [16, 32], strides = [1, 1]} : vector<16x384xf32> to vector<16x32xf32>
    %59 = vector.extract_strided_slice %6 {offsets = [0, 320], sizes = [16, 32], strides = [1, 1]} : vector<16x384xf32> to vector<16x32xf32>
    %60 = arith.truncf %57 : vector<16x32xf32> to vector<16x32xbf16>
    %61 = arith.truncf %58 : vector<16x32xf32> to vector<16x32xbf16>
    %cst_19 = arith.constant dense<0.000000e+00> : vector<16x16xf32>
    %62 = tpu.matmul %60, %61, %cst_19 {dimension_numbers = #tpu.dot_dimension_numbers<[1], [1], [0], [0], [0, 0, 1, 0], [], []>} : vector<16x32xbf16>, vector<16x32xbf16>, vector<16x16xf32> -> vector<16x16xf32>
    %cst_20 = arith.constant dense<0xFF800000> : vector<16xf32>
    %63 = vector.multi_reduction <maximumf>, %62, %cst_20 [1] : vector<16x16xf32> to vector<16xf32>
    %64 = vector.shape_cast %63 : vector<16xf32> to vector<16x1xf32>
    %65 = vector.broadcast %64 : vector<16x1xf32> to vector<16x16xf32>
    %66 = arith.subf %62, %65 : vector<16x16xf32>
    %67 = math.exp %66 : vector<16x16xf32>
    %cst_21 = arith.constant dense<0.000000e+00> : vector<16xf32>
    %68 = vector.multi_reduction <add>, %67, %cst_21 [1] : vector<16x16xf32> to vector<16xf32>
    %69 = vector.shape_cast %68 : vector<16xf32> to vector<16x1xf32>
    %70 = tpu.reciprocal %69 {approx = true} : vector<16x1xf32> -> vector<16x1xf32>
    %71 = vector.broadcast %70 : vector<16x1xf32> to vector<16x16xf32>
    %72 = arith.mulf %67, %71 : vector<16x16xf32>
    %73 = arith.truncf %72 : vector<16x16xf32> to vector<16x16xbf16>
    %74 = arith.truncf %59 : vector<16x32xf32> to vector<16x32xbf16>
    %cst_22 = arith.constant dense<0.000000e+00> : vector<16x32xf32>
    %75 = tpu.matmul %73, %74, %cst_22 {dimension_numbers = #tpu.dot_dimension_numbers<[1], [0], [0], [1], [0, 0, 1, 1], [], []>} : vector<16x16xbf16>, vector<16x32xbf16>, vector<16x32xf32> -> vector<16x32xf32>
    %76 = arith.truncf %75 : vector<16x32xf32> to vector<16x32xbf16>
    %77 = vector.extract_strided_slice %7 {offsets = [64, 0], sizes = [32, 128], strides = [1, 1]} : vector<128x128xbf16> to vector<32x128xbf16>
    %cst_23 = arith.constant dense<0.000000e+00> : vector<16x128xf32>
    %78 = tpu.matmul %76, %77, %cst_23 {dimension_numbers = #tpu.dot_dimension_numbers<[1], [0], [0], [1], [0, 0, 1, 1], [], []>} : vector<16x32xbf16>, vector<32x128xbf16>, vector<16x128xf32> -> vector<16x128xf32>
    %79 = arith.addf %56, %78 : vector<16x128xf32>
    %80 = vector.extract_strided_slice %6 {offsets = [0, 96], sizes = [16, 32], strides = [1, 1]} : vector<16x384xf32> to vector<16x32xf32>
    %81 = vector.extract_strided_slice %6 {offsets = [0, 224], sizes = [16, 32], strides = [1, 1]} : vector<16x384xf32> to vector<16x32xf32>
    %82 = vector.extract_strided_slice %6 {offsets = [0, 352], sizes = [16, 32], strides = [1, 1]} : vector<16x384xf32> to vector<16x32xf32>
    %83 = arith.truncf %80 : vector<16x32xf32> to vector<16x32xbf16>
    %84 = arith.truncf %81 : vector<16x32xf32> to vector<16x32xbf16>
    %cst_24 = arith.constant dense<0.000000e+00> : vector<16x16xf32>
    %85 = tpu.matmul %83, %84, %cst_24 {dimension_numbers = #tpu.dot_dimension_numbers<[1], [1], [0], [0], [0, 0, 1, 0], [], []>} : vector<16x32xbf16>, vector<16x32xbf16>, vector<16x16xf32> -> vector<16x16xf32>
    %cst_25 = arith.constant dense<0xFF800000> : vector<16xf32>
    %86 = vector.multi_reduction <maximumf>, %85, %cst_25 [1] : vector<16x16xf32> to vector<16xf32>
    %87 = vector.shape_cast %86 : vector<16xf32> to vector<16x1xf32>
    %88 = vector.broadcast %87 : vector<16x1xf32> to vector<16x16xf32>
    %89 = arith.subf %85, %88 : vector<16x16xf32>
    %90 = math.exp %89 : vector<16x16xf32>
    %cst_26 = arith.constant dense<0.000000e+00> : vector<16xf32>
    %91 = vector.multi_reduction <add>, %90, %cst_26 [1] : vector<16x16xf32> to vector<16xf32>
    %92 = vector.shape_cast %91 : vector<16xf32> to vector<16x1xf32>
    %93 = tpu.reciprocal %92 {approx = true} : vector<16x1xf32> -> vector<16x1xf32>
    %94 = vector.broadcast %93 : vector<16x1xf32> to vector<16x16xf32>
    %95 = arith.mulf %90, %94 : vector<16x16xf32>
    %96 = arith.truncf %95 : vector<16x16xf32> to vector<16x16xbf16>
    %97 = arith.truncf %82 : vector<16x32xf32> to vector<16x32xbf16>
    %cst_27 = arith.constant dense<0.000000e+00> : vector<16x32xf32>
    %98 = tpu.matmul %96, %97, %cst_27 {dimension_numbers = #tpu.dot_dimension_numbers<[1], [0], [0], [1], [0, 0, 1, 1], [], []>} : vector<16x16xbf16>, vector<16x32xbf16>, vector<16x32xf32> -> vector<16x32xf32>
    %99 = arith.truncf %98 : vector<16x32xf32> to vector<16x32xbf16>
    %100 = vector.extract_strided_slice %7 {offsets = [96, 0], sizes = [32, 128], strides = [1, 1]} : vector<128x128xbf16> to vector<32x128xbf16>
    %cst_28 = arith.constant dense<0.000000e+00> : vector<16x128xf32>
    %101 = tpu.matmul %99, %100, %cst_28 {dimension_numbers = #tpu.dot_dimension_numbers<[1], [0], [0], [1], [0, 0, 1, 1], [], []>} : vector<16x32xbf16>, vector<32x128xbf16>, vector<16x128xf32> -> vector<16x128xf32>
    %102 = arith.addf %79, %101 : vector<16x128xf32>
    %103 = arith.truncf %102 : vector<16x128xf32> to vector<16x128xbf16>
    %c0_29 = arith.constant 0 : index
    %c0_30 = arith.constant 0 : index
    %104 = vector.load %arg6[%c0_29, %c0_30] : memref<128x128xbf16, #tpu.memory_space<vmem>>, vector<128x128xbf16>
    %cst_31 = arith.constant dense<0.000000e+00> : vector<16x128xf32>
    %105 = tpu.matmul %103, %104, %cst_31 {dimension_numbers = #tpu.dot_dimension_numbers<[1], [0], [0], [1], [0, 0, 1, 1], [], []>} : vector<16x128xbf16>, vector<128x128xbf16>, vector<16x128xf32> -> vector<16x128xf32>
    %106 = arith.addf %102, %105 : vector<16x128xf32>
    %c0_32 = arith.constant 0 : index
    %c0_33 = arith.constant 0 : index
    %107 = vector.load %arg7[%c0_32, %c0_33] : memref<16x128xf32, #tpu.memory_space<vmem>>, vector<16x128xf32>
    tpu.vector_store %arg7[%c0_32, %c0_33], %106 {strides = array<i32>} : memref<16x128xf32, #tpu.memory_space<vmem>>, vector<16x128xf32>,
    return
  }
  func.func @transform_0(%arg0: i32) -> (i32, i32) {
    %c0_i32 = arith.constant 0 : i32
    %c0_i32_0 = arith.constant 0 : i32
    return %c0_i32, %arg0 : i32, i32
  }
  func.func @transform_1(%arg0: i32) -> (i32, i32) {
    %c0_i32 = arith.constant 0 : i32
    %c0_i32_0 = arith.constant 0 : i32
    %c0_i32_1 = arith.constant 0 : i32
    return %c0_i32, %c0_i32_0 : i32, i32
  }
  func.func @transform_2(%arg0: i32) -> (i32, i32) {
    %c0_i32 = arith.constant 0 : i32
    %c0_i32_0 = arith.constant 0 : i32
    %c0_i32_1 = arith.constant 0 : i32
    return %c0_i32, %c0_i32_0 : i32, i32
  }
  func.func @transform_3(%arg0: i32) -> (i32, i32) {
    %c0_i32 = arith.constant 0 : i32
    %c0_i32_0 = arith.constant 0 : i32
    %c0_i32_1 = arith.constant 0 : i32
    return %c0_i32, %c0_i32_0 : i32, i32
  }
  func.func @transform_4(%arg0: i32) -> (i32, i32) {
    %c0_i32 = arith.constant 0 : i32
    %c0_i32_0 = arith.constant 0 : i32
    %c0_i32_1 = arith.constant 0 : i32
    return %c0_i32, %c0_i32_0 : i32, i32
  }
  func.func @transform_5(%arg0: i32) -> (i32, i32) {
    %c0_i32 = arith.constant 0 : i32
    %c0_i32_0 = arith.constant 0 : i32
    %c0_i32_1 = arith.constant 0 : i32
    return %c0_i32, %c0_i32_0 : i32, i32
  }
  func.func @transform_6(%arg0: i32) -> (i32, i32) {
    %c0_i32 = arith.constant 0 : i32
    %c0_i32_0 = arith.constant 0 : i32
    return %c0_i32, %arg0 : i32, i32
  }
}

</mosaic_0001>

<bundles_post_ra>
// kernel: tpu_custom_call.1
= control target key start
LH: loop header
LB: loop body
LE: loop exit
PB: predicated region body
PF: predicated region fallthrough
CT: control target
= control target key end

     0   :  { %s2072_s0 = inlined_call_operand.hbm [shape: f32[16,256], index: 0, kind: input, shape index: {}]   ;;  %s2073_s1 = inlined_call_operand.hbm [shape: bf16[128,384], index: 1, kind: input, shape index: {}]   ;;  %s2074_s2 = inlined_call_operand.hbm [shape: f32[1,384], index: 2, kind: input, shape index: {}]   ;;  %s2075_s3 = inlined_call_operand.hbm [shape: bf16[128,128], index: 3, kind: input, shape index: {}]   ;;  %s2076_s4 = inlined_call_operand.vmem [shape: f32[1,128], index: 4, kind: input, shape index: {}]   ;;  %s2077_s5 = inlined_call_operand.hbm [shape: bf16[128,128], index: 5, kind: input, shape index: {}]   ;;  %s2078_s6 = inlined_call_operand.hbm [shape: f32[16,256], index: 6, kind: output, shape index: {}]  }
   0x1   :  { %2079 = sst [smem:[#allocation16_spill]] %s2073_s1 }
   0x2   :  { %11 = vsyncpa [#allocation3], 0 }
   0x3   :  { %13 = vsyncpa [#allocation3 + $0x1], 0 }
   0x4   :  { %14 = vsyncpa [#allocation6], 0 }
   0x5   :  { %15 = vsyncpa [#allocation9], 0 }
   0x6   :  { %16 = vsyncpa [#allocation4], 0 }
   0x7   :  { %18 = vsyncpa [#allocation4 + $0x1], 0  ;;  %s1820_s21 = smov 0   ;;  %s1822_s22 = smov 0  }
   0x8   :  { %s1824_s23 = smov 0   ;;  %s1826_s24 = smov 0  }
   0x9 LB: > { %s1841_s25 = sadd.s32 4294967295, %s1766_s24   ;;  %s1177_s26 = sadd.s32 4294967294, %s1766_s24   ;;  %s1766_s24 = sphi %s1826_s24, %s2091_s24   ;;  %s1762_s23 = sphi %s1824_s23, %s2090_s23   ;;  %s1758_s22 = sphi %s1822_s22, %s2089_s22   ;;  %s1754_s21 = sphi %s1820_s21, %s2088_s21  }
   0xa   : > { %p44_p0 = scmp.ne.s32.totalorder %s1758_s22, %s1754_s21  ;;  %p45_p1 = scmp.eq.s32.totalorder %s1841_s25, 0 }
   0xb   : > { %p173_p2 = scmp.eq.s32.totalorder %s1841_s25, 1  ;;  %p179_p3 = scmp.eq.s32.totalorder %s1177_s26, 1 }
   0xc   : > { %p1850_p4 = por %p45_p1, %p44_p0  ;;  %p1178_p5 = scmp.ge.s32.totalorder %s1766_s24, 1 }
   0xd   : > { %p1855_p6 = por %p179_p3, %p44_p0  ;;  %p186_p7 = scmp.lt.s32.totalorder %s1766_s24, 3 }
   0xe   : > { %s2082_s1 = sld [smem:[#allocation16_spill]]  ;;  %s1768_s9 = smov [#allocation5]  }
   0xf   : > { %p1863_p8 = pnand %p1178_p5, %p186_p7  ;;  %s199_s10 = sshll.u32 %s1768_s9, 4  ;;  %s200_s10 = int_to_ptr.vmem [resolvable:$true] %s199_s10 }
  0x10   : > { %s223_s14 = sshll.u32 %s2075_s3, 4  ;;  %s1769_s15 = smov 192   ;;  %s224_s14 = int_to_ptr.hbm [resolvable:$true] %s223_s14 }
  0x11   : > { %p1429_p9 = pneg %p1863_p8  ;;  %s1770_s16 = smov 12  }
  0x12   : > { %s1771_s17 = smov [#allocation8]   ;;  %s1772_s19 = smov 64  }
  0x13   : > { %p1871_p10 = pnand %p1429_p9, %p45_p1  ;;  %s225_s18 = sshll.u32 %s1771_s17, 4  ;;  %s226_s18 = int_to_ptr.vmem [resolvable:$true] %s225_s18 }
  0x14   : > { %s197_s7 = sshll.u32 %s2082_s1, 4  ;;  %s1773_s20 = smov 4   ;;  %s198_s7 = int_to_ptr.hbm [resolvable:$true] %s197_s7 }
  0x15   : > { %1432 = dma.hbm_to_vmem [thread:$0]  (!%p1871_p10), %s198_s7, 3072, %s200_s10, [#allocation6], %s1769_s15, %s1769_s15, %s1770_s16  }
  0x16   : > { %1438 = dma.hbm_to_vmem [thread:$0]  (!%p1871_p10), %s224_s14, 1024, %s226_s18, [#allocation9], %s1772_s19, %s1772_s19, %s1773_s20  }
  0x17   : > { %s212_s30 = sshll.u32 %s2074_s2, 4  ;;  %s1774_s7 = smov [#allocation7]   ;;  %s213_s30 = int_to_ptr.hbm [resolvable:$true] %s212_s30 }
  0x18   : > { %s214_s9 = sshll.u32 %s1774_s7, 4  ;;  %s240_s13 = sshll.u32 %s2077_s5, 4  ;;  %s215_s9 = int_to_ptr.vmem [resolvable:$true] %s214_s9  ;;  %s241_s13 = int_to_ptr.hbm [resolvable:$true] %s240_s13 }
  0x19   : > { %1435 = dma.hbm_to_vmem [thread:$0]  (!%p1871_p10), %s213_s30, 48, %s215_s9, [#allocation6]  }
  0x1a   : > { %s1775_s14 = smov [#allocation10]   ;;  %s1894_s16 = sadd.s32 1, %s1766_s24  }
  0x1b   : > { %s242_s15 = sshll.u32 %s1775_s14, 4  ;;  %s31_s17 = sadd.s32 1, %s1762_s23  ;;  %s243_s15 = int_to_ptr.vmem [resolvable:$true] %s242_s15 }
  0x1c   : > { %1441 = dma.hbm_to_vmem [thread:$0]  (!%p1871_p10), %s241_s13, 1024, %s243_s15, [#allocation9], %s1772_s19, %s1772_s19, %s1773_s20  }
  0x1d   : > { %s28_s18 = ssub.s32 %s1766_s24, %s1894_s16  ;;  %p38_p12 = scmp.ne.s32.totalorder %s1762_s23, %s1758_s22 }
  0x1e   : > { %p29_p13 = scmp.eq.s32.totalorder %s28_s18, 0  ;;  %p39_p0 = scmp.eq.s32.totalorder %s1766_s24, 0 }
  0x1f   : > { %p1904_p3 = por %p173_p2, %p38_p12  ;;  %p1454_p5 = scmp.lt.s32.totalorder %s1766_s24, 2 }
  0x20   : > { %s1910_s29 = scalar_select %p29_p13, %s1762_s23, %s31_s17  }
  0x21   : > { %p40_p7 = por %p39_p0, %p38_p12  ;;  %s256_s30 = sand.u32 1, %s1762_s23  }
  0x22   : > { %s1184_s11 = sshll.u32 %s256_s30, 4  ;;  %s1185_s19 = sshll.u32 %s1766_s24, 3 }
  0x23   : > { %s264_s9 = scalar_lea.hbm %s2072_s0, %s1185_s19  ;;  %s260_s10 = scalar_lea.vmem [#allocation2], %s1184_s11 }
  0x24   : > { %s267_s12 = sshll.u32 %s260_s10, 4  ;;  %s265_s13 = sshll.u32 %s264_s9, 4  ;;  %s268_s12 = int_to_ptr.vmem [resolvable:$true] %s267_s12  ;;  %s266_s13 = int_to_ptr.hbm [resolvable:$true] %s265_s13 }
  0x25   : > { %p1917_p2 = pnand %p1454_p5, %p40_p7  ;;  %s257_s15 = scalar_lea.sflag [#allocation3], %s256_s30 }
  0x26   : > { %s1662_s17 = sshra.s32 %s266_s13, 4  ;;  %s1669_s20 = scalar_lea.hbm %s2072_s0, 32  ;;  %s1663_s17 = int_to_ptr.hbm [resolvable:$true] %s1662_s17 }
  0x27   : > { %s1664_s18 = scalar_lea.hbm %s1663_s17, 16  ;;  %p1666_p10 = pneg %p1917_p2 }
  0x28   : > { %p1665_p9 = scmp.ne.s32.totalorder %s1663_s17, %s1664_s18  ;;  %p1670_p0 = scmp.lt.s32.totalorder %s1663_s17, %s2072_s0 }
  0x29   : > { %p1671_p5 = scmp.lt.s32.totalorder %s1669_s20, %s1664_s18 }
  0x2a   : > { %p1667_p12 = pnand %p1666_p10, %p1665_p9 }
  0x2b   : > { %p1672_p7 = por %p1671_p5, %p1670_p0 }
  0x2c   : > { %p1668_p13 = pneg %p1667_p12 }
  0x2e   : > { %p1673_p11 = pnand %p1672_p7, %p1668_p13 }
  0x30   : > { %1676 = shalt.err (!%p1673_p11)
}
  0x31   : > { %s1776_s30 = smov 256   ;;  %s1777_s10 = smov 128  }
  0x32   : > { %s1778_s1 = smov 8   ;;  %279 = sbr.rel (%p1863_p8) target bundleno = 1752 (0x6d8), region = 44 }
  0x33   : > { %1445 = dma.hbm_to_vmem [thread:$0]  (!%p1917_p2), %s266_s13, 256, %s268_s12, %s257_s15, %s1776_s30, %s1777_s10, %s1778_s1  }
  0x34   : > { %s1934_s19 = sand.u32 (!%p1863_p8), 1, %s1758_s22  }
  0x35   : > { %s1187_s17 = sshll.u32 (!%p1863_p8), %s1934_s19, 4  ;;  %s282_s18 = scalar_lea.sflag (!%p1863_p8), [#allocation3], %s1934_s19 }
  0x36   : > { %s1940_s11 = scalar_lea.vmem (!%p1863_p8), [#allocation2], %s1187_s17 }
  0x37   : > { %1737 = dma.done.wait (%p1850_p4), %s282_s18, 256  }
  0x38   : > { %1739 = vsyncadd (%p1850_p4), %s282_s18, 4294967040 }
  0x39   : > { %1741 = dma.done.wait (%p45_p1), [#allocation6], 3120  }
  0x3a   : > { %1743 = vsyncadd (%p45_p1), [#allocation6], 4294964176 }
  0x3b   : > { %1745 = dma.done.wait (%p45_p1), [#allocation9], 2048  }
  0x3c   : > { %1747 = vsyncadd (%p45_p1), [#allocation9], 4294965248  ;;  %v1279_v0 = vld [vmem:[#allocation5 + $0xa8] sm:$0xf]  ;;  %v1391_v1 = vld [vmem:[#allocation5 + $0xb0] sm:$0xf0] }
  0x3d   : > { %v1390_v2 = vld [vmem:[#allocation5 + $0xac] sm:$0xf]  ;;  %v1280_v3 = vor.u32 %v1391_v1, %v1279_v0  ;;  %v1281_v4 = vld [vmem:[#allocation5 + $0xb4] sm:$0xf0]  ;;  %v1267_v5 = vld [vmem:[#allocation5 + $0x90] sm:$0xf] }
  0x3e   : > { %v1388_v6 = vld [vmem:[#allocation5 + $0x98] sm:$0xf0]  ;;  %v1284_v7 = vor.u32 %v1390_v2, %v1281_v4  ;;  %v1387_v8 = vld [vmem:[#allocation5 + $0x94] sm:$0xf]  ;;  %v1269_v9 = vld [vmem:[#allocation5 + $0x9c] sm:$0xf0] }
  0x3f   : > { %507 = vmatpush.bf16.msra.mxu0 %v1280_v3  ;;  %v1268_v10 = vor.u32 %v1388_v6, %v1267_v5  ;;  %v1272_v11 = vor.u32 %v1387_v8, %v1269_v9  ;;  %v1255_v12 = vld [vmem:[#allocation5 + $0x78] sm:$0xf]  ;;  %v1385_v13 = vld [vmem:[#allocation5 + $0x80] sm:$0xf0]  ;;  %v1384_v14 = vld [vmem:[#allocation5 + $0x7c] sm:$0xf] }
  0x40   : > { %521 = vmatpush.bf16.msra.mxu1 %v1284_v7  ;;  %v1257_v15 = vld [vmem:[#allocation5 + $0x84] sm:$0xf0]  ;;  %v1256_v16 = vor.u32 %v1385_v13, %v1255_v12  ;;  %v1243_v18 = vld [vmem:[#allocation5 + $0x60] sm:$0xf]  ;;  %v1382_v19 = vld [vmem:[#allocation5 + $0x68] sm:$0xf0] }
  0x41   : > { %v1260_v17 = vor.u32 %v1384_v14, %v1257_v15  ;;  %v1381_v20 = vld [vmem:[#allocation5 + $0x64] sm:$0xf]  ;;  %v1245_v21 = vld [vmem:[#allocation5 + $0x6c] sm:$0xf0]  ;;  %v1244_v22 = vor.u32 %v1382_v19, %v1243_v18  ;;  %v1231_v24 = vld [vmem:[#allocation5 + $0x48] sm:$0xf] }
  0x42   : > { %v1248_v23 = vor.u32 %v1381_v20, %v1245_v21  ;;  %v1379_v25 = vld [vmem:[#allocation5 + $0x50] sm:$0xf0]  ;;  %v1378_v26 = vld [vmem:[#allocation5 + $0x4c] sm:$0xf]  ;;  %v1233_v27 = vld [vmem:[#allocation5 + $0x54] sm:$0xf0] }
  0x43   : > { %508 = vmatpush.bf16.msra.mxu0 %v1268_v10  ;;  %v1232_v28 = vor.u32 %v1379_v25, %v1231_v24  ;;  %v1236_v29 = vor.u32 %v1378_v26, %v1233_v27  ;;  %v1219_v30 = vld [vmem:[#allocation5 + $0x30] sm:$0xf]  ;;  %v1376_v31 = vld [vmem:[#allocation5 + $0x38] sm:$0xf0]  ;;  %v1375_v32 = vld [vmem:[#allocation5 + $0x34] sm:$0xf] }
  0x44   : > { %522 = vmatpush.bf16.msra.mxu1 %v1272_v11  ;;  %v1221_v33 = vld [vmem:[#allocation5 + $0x3c] sm:$0xf0]  ;;  %v1220_v34 = vor.u32 %v1376_v31, %v1219_v30  ;;  %v1207_v36 = vld [vmem:[#allocation5 + $0x18] sm:$0xf]  ;;  %v1373_v37 = vld [vmem:[#allocation5 + $0x20] sm:$0xf0] }
  0x45   : > { %v1224_v35 = vor.u32 %v1375_v32, %v1221_v33  ;;  %v1372_v38 = vld [vmem:[#allocation5 + $0x1c] sm:$0xf]  ;;  %v1209_v39 = vld [vmem:[#allocation5 + $0x24] sm:$0xf0]  ;;  %v1208_v40 = vor.u32 %v1373_v37, %v1207_v36  ;;  %v1195_v42 = vld [vmem:[#allocation5] sm:$0xf] }
  0x46   : > { %v1212_v41 = vor.u32 %v1372_v38, %v1209_v39  ;;  %v1370_v43 = vld [vmem:[#allocation5 + $0x8] sm:$0xf0]  ;;  %v1369_v44 = vld [vmem:[#allocation5 + $0x4] sm:$0xf]  ;;  %v1197_v45 = vld [vmem:[#allocation5 + $0xc] sm:$0xf0] }
  0x47   : > { %509 = vmatpush.bf16.msra.mxu0 %v1256_v16  ;;  %v1196_v46 = vor.u32 %v1370_v43, %v1195_v42  ;;  %v1955_v47 = vld [vmem:[%s1940_s11] sm:$0xff]  ;;  %v1958_v48 = vld [vmem:[%s1940_s11 + $0x8] sm:$0xff]  ;;  %v1200_v49 = vor.u32 %v1369_v44, %v1197_v45  ;;  %vm573_vm0 = vcmask 261120   ;;  %s1779_s1 = smov 96   ;;  %vm594_vm1 = vcmask 130048   ;;  %s1780_s27 = smov 64  }
  0x48   : > { %523 = vmatpush.bf16.msra.mxu1 %v1260_v17  ;;  %v338_v50 = vpack.c.bf16 %v1958_v48, %v1955_v47  ;;  %v1962_v52 = vld [vmem:[#allocation7] sm:$0x7]  ;;  %v1287_v1 = vld [vmem:[#allocation5 + $0xb0] sm:$0xf]  ;;  %v1392_v2 = vld [vmem:[#allocation5 + $0xb8] sm:$0xf0] }
  0x49   : > { %v374_v54 = vperm.slane %v1962_v52, 1  ;;  %v373_v58 = vperm.slane %v1962_v52, 0  ;;  %v1288_v3 = vor.u32 %v1392_v2, %v1287_v1  ;;  %v1275_v4 = vld [vmem:[#allocation5 + $0x98] sm:$0xf]  ;;  %v1389_v5 = vld [vmem:[#allocation5 + $0xa0] sm:$0xf0] }
  0x4a   : > { %v1276_v6 = vor.u32 %v1389_v5, %v1275_v4  ;;  %v1263_v7 = vld [vmem:[#allocation5 + $0x80] sm:$0xf]  ;;  %v1386_v8 = vld [vmem:[#allocation5 + $0x88] sm:$0xf0]  ;;  %v1251_v9 = vld [vmem:[#allocation5 + $0x68] sm:$0xf] }
  0x4b   : > { %510 = vmatpush.bf16.msra.mxu0 %v1244_v22  ;;  %535 = vmatpush.bf16.msra.mxu2 %v1288_v3  ;;  %v1264_v10 = vor.u32 %v1386_v8, %v1263_v7  ;;  %v1383_v11 = vld [vmem:[#allocation5 + $0x70] sm:$0xf0]  ;;  %v1239_v13 = vld [vmem:[#allocation5 + $0x50] sm:$0xf]  ;;  %v1380_v14 = vld [vmem:[#allocation5 + $0x58] sm:$0xf0] }
  0x4c   : > { %524 = vmatpush.bf16.msra.mxu1 %v1248_v23  ;;  %v1252_v12 = vor.u32 %v1383_v11, %v1251_v9  ;;  %v1240_v15 = vor.u32 %v1380_v14, %v1239_v13  ;;  %v1227_v16 = vld [vmem:[#allocation5 + $0x38] sm:$0xf]  ;;  %v1377_v17 = vld [vmem:[#allocation5 + $0x40] sm:$0xf0]  ;;  %v1215_v19 = vld [vmem:[#allocation5 + $0x20] sm:$0xf] }
  0x4d   : > { %v1228_v18 = vor.u32 %v1377_v17, %v1227_v16  ;;  %v1374_v20 = vld [vmem:[#allocation5 + $0x28] sm:$0xf0]  ;;  %v1203_v22 = vld [vmem:[#allocation5 + $0x8] sm:$0xf]  ;;  %v1371_v23 = vld [vmem:[#allocation5 + $0x10] sm:$0xf0] }
  0x4e   : > { %v1216_v21 = vor.u32 %v1374_v20, %v1215_v19  ;;  %v1204_v24 = vor.u32 %v1371_v23, %v1203_v22  ;;  %s1781_s8 = smov 32   ;;  %v1394_v4 = vld [vmem:[#allocation8 + $0x8] sm:$0xff]  ;;  %v1393_v5 = vld [vmem:[#allocation8] sm:$0xff]  ;;  %v1395_v9 = vld [vmem:[#allocation8 + $0x10] sm:$0xff]  ;;  %s1366_s14 = sshll.u32 %s1841_s25, 3 }
  0x4f   : > { %511 = vmatpush.bf16.msra.mxu0 %v1232_v28  ;;  %536 = vmatpush.bf16.msra.mxu2 %v1276_v6  ;;  %v1396_v6 = vld [vmem:[#allocation8 + $0x18] sm:$0xff]  ;;  %s1062_s7 = scalar_lea.hbm %s2078_s6, %s1366_s14  ;;  %s334_s9 = scalar_lea.vmem [#allocation11], %s1187_s17 }
  0x50   : > { %525 = vmatpush.bf16.msra.mxu1 %v1236_v29  ;;  %s1063_s30 = sshll.u32 %s334_s9, 4  ;;  %s1065_s10 = sshll.u32 %s1062_s7, 4  ;;  %s1064_s30 = int_to_ptr.vmem [resolvable:$true] %s1063_s30  ;;  %s1066_s10 = int_to_ptr.hbm [resolvable:$true] %s1065_s10 }
  0x51   : > { %s1052_s18 = scalar_lea.sflag [#allocation4], %s1934_s19  ;;  %s1706_s11 = sshra.s32 %s1066_s10, 4  ;;  %s1707_s11 = int_to_ptr.hbm [resolvable:$true] %s1706_s11 }
  0x52   : > { %s1708_s25 = scalar_lea.hbm %s1707_s11, 16  ;;  %s1712_s17 = scalar_lea.hbm %s2078_s6, 32 }
  0x53   : > { %512 = vmatpush.bf16.msra.mxu0 %v1220_v34  ;;  %537 = vmatpush.bf16.msra.mxu2 %v1264_v10  ;;  %p1709_p1 = scmp.ne.s32.totalorder %s1707_s11, %s1708_s25  ;;  %p1713_p11 = scmp.lt.s32.totalorder %s1707_s11, %s2078_s6 }
  0x54   : > { %526 = vmatpush.bf16.msra.mxu1 %v1224_v35  ;;  %v375_v35 = vperm.slane %v1962_v52, 2  ;;  %p1714_p2 = scmp.lt.s32.totalorder %s1712_s17, %s1708_s25 }
  0x55   : > { %p1710_p4 = pnand %p1709_p1, %p1904_p3 }
  0x56   : > { %p1715_p9 = por %p1714_p2, %p1713_p11 }
  0x57   : > { %513 = vmatpush.bf16.msra.mxu0 %v1208_v40  ;;  %538 = vmatpush.bf16.msra.mxu2 %v1252_v12  ;;  %p1711_p8 = pneg %p1710_p4 }
  0x58   : > { %527 = vmatpush.bf16.msra.mxu1 %v1212_v41 }
  0x59   : > { %p1716_p10 = pnand %p1715_p9, %p1711_p8 }
  0x5b   : > { %514 = vmatpush.bf16.msra.mxu0 %v1196_v46  ;;  %539 = vmatpush.bf16.msra.mxu2 %v1240_v15 }
  0x5c   : > { %528 = vmatpush.bf16.msra.mxu1 %v1200_v49 }
  0x5e   : > { %515 = vmatmul.bf16.vlgmr.msra.gmra.mxu0 %v338_v50 }
  0x5f   : > { %529 = vmatmul.bf16.vlgmr.msra.gmra.mxu1 %v338_v50  ;;  %540 = vmatpush.bf16.msra.mxu2 %v1228_v18 }
  0x63   : > { %541 = vmatpush.bf16.msra.mxu2 %v1216_v21 }
  0x67   : > { %542 = vmatpush.bf16.msra.mxu2 %v1204_v24 }
  0x6a   : > { %543 = vmatmul.bf16.vlgmr.msra.gmra.mxu2 %v338_v50 }
  0xdb   : > { %v516_v53 = vpop.f32.mrf.mxu0 }
  0xdc   : > { %v530_v51 = vpop.f32.mrf.mxu1  ;;  %v517_v62 = vadd.f32 %v516_v53, %v373_v58 }
  0xdd   : > { %v531_v56 = vadd.f32 %v530_v51, %v374_v54 }
  0xe3   : > { %v518_v60 = vpop.f32.mrf.mxu0 }
  0xe4   : > { %v532_v55 = vpop.f32.mrf.mxu1  ;;  %v519_v63 = vadd.f32 %v518_v60, %v373_v58 }
  0xe5   : > { %v533_v57 = vadd.f32 %v532_v55, %v374_v54 }
  0xe6   : > { %v1972_v0 = vpack.c.bf16 %v519_v63, %v517_v62 }
  0xe7   : > { %v1966_v59 = vpack.c.bf16 %v533_v57, %v531_v56 }
  0xe9   : > { %672 = vrot.lane.b32.xlu0 %v1966_v59, %s1779_s1  ;;  %v578_v61 = vsel %vm573_vm0, %v1966_v59, 0 }
  0xea   : > { %587 = vmatpush.bf16.xpose.msra.mxu3 %v578_v61 }
  0xed   : > { %v544_v33 = vpop.f32.mrf.mxu2 }
  0xee   : > { %v545_v38 = vadd.f32 %v544_v33, %v375_v35 }
  0xf1   : > { %669 = vrot.lane.b32.xlu0 %v1972_v0, %s1779_s1  ;;  %1289 = vmatmul.msk.bf16.vlgmr.msra.gmra.mxu3 %vm573_vm0, %v1972_v0 }
  0xf5   : > { %v546_v41 = vpop.f32.mrf.mxu2 }
  0xf6   : > { %v547_v42 = vadd.f32 %v546_v41, %v375_v35 }
  0xf8   : > { %v1985_v44 = vpack.c.bf16 %v547_v42, %v545_v38 }
  0xfa   : > { %629 = vmatpush.bf16.msrb.mxu3 %v1985_v44 }
  0xfe   : > { %658 = vmatpush.bf16.msra.mxu3 %v1394_v4 }
 0x102   : > { %659 = vmatpush.bf16.msra.mxu3 %v1393_v5 }
 0x15b   : > { %v673_v25 = vpop.permute.xlu0 %672 }
 0x15c   : > { %v678_v26 = vsel %vm573_vm0, %v673_v25, 0 }
 0x15d   : > { %687 = vmatpush.bf16.xpose.msrb.mxu0 %v678_v26 }
 0x163   : > { %v670_v27 = vpop.permute.xlu0 %669 }
 0x164   : > { %1300 = vmatmul.msk.bf16.vlgmr.msrb.gmra.mxu0 %vm573_vm0, %v670_v27 }
 0x174   : > { %v589_v28 = vpop.f32.mrf.mxu3 }
 0x175   : > { %v595_v29 = vsel %vm594_vm1, %v589_v28, -inf }
 0x176   : > { %596 = vmax.xlane.f32.xlu2 %v595_v29 }
 0x17c   : > { %v591_v30 = vpop.f32.mrf.mxu3 }
 0x17d   : > { %v598_v31 = vsel %vm594_vm1, %v591_v30, -inf }
 0x17e   : > { %599 = vmax.xlane.f32.xlu2 %v598_v31 }
 0x1e1   : > { %v689_v32 = vpop.f32.mrf.mxu0 }
 0x1e2   : > { %v694_v34 = vsel %vm594_vm1, %v689_v32, -inf }
 0x1e3   : > { %695 = vmax.xlane.f32.xlu1 %v694_v34 }
 0x1e9   : > { %v691_v36 = vpop.f32.mrf.mxu0  ;;  %v597_v37 = vpop.xlane.xlu2 %596 }
 0x1ea   : > { %v601_v39 = vsub.f32 %v589_v28, %v597_v37  ;;  %v697_v40 = vsel %vm594_vm1, %v691_v36, -inf }
 0x1eb   : > { %698 = vmax.xlane.f32.xlu1 %v697_v40 }
 0x1ec   : > { %v603_v43 = vmul.f32 1.442695, %v601_v39 }
 0x1ee   : > { %1510 = vpow2.f32 %v603_v43 }
 0x1f1   : > { %v600_v52 = vpop.xlane.xlu2 %599 }
 0x1f2   : > { %v602_v56 = vsub.f32 %v591_v30, %v600_v52 }
 0x1f4   : > { %v1511_v45 = vpop.eup %1510  ;;  %v605_v60 = vmul.f32 1.442695, %v602_v56 }
 0x1f5   : > { %v607_v46 = vsel %vm594_vm1, %v1511_v45, 0.0 }
 0x1f6   : > { %608 = vadd.xlane.f32.xlu2 %v607_v46 }
 0x20e   : > { %718 = vrot.lane.b32.xlu2 %v1985_v44, %s1779_s1 }
 0x216   : > { %772 = vrot.lane.b32.xlu2 %v1966_v59, %s1780_s27 }
 0x21e   : > { %869 = vrot.lane.b32.xlu2 %v1972_v0, %s1781_s8 }
 0x256   : > { %v696_v49 = vpop.xlane.xlu1 %695 }
 0x257   : > { %v700_v50 = vsub.f32 %v689_v32, %v696_v49  ;;  %v1509_v32 = vld [vmem:[%s2076_s4] ss:$0 sm:$0xff] }
 0x258   : > { %v569_v33 = vadd.f32 %v1509_v32, %v1955_v47  ;;  %v570_v38 = vadd.f32 %v1509_v32, %v1958_v48 }
 0x259   : > { %v702_v51 = vmul.f32 1.442695, %v700_v50 }
 0x25b   : > { %1512 = vpow2.f32 %v702_v51 }
 0x25e   : > { %v699_v53 = vpop.xlane.xlu1 %698 }
 0x25f   : > { %v701_v54 = vsub.f32 %v691_v36, %v699_v53 }
 0x261   : > { %v1513_v55 = vpop.eup %1512  ;;  %v704_v57 = vmul.f32 1.442695, %v701_v54 }
 0x262   : > { %v706_v58 = vsel %vm594_vm1, %v1513_v55, 0.0 }
 0x263   : > { %1514 = vpow2.f32 %v704_v57  ;;  %707 = vadd.xlane.f32.xlu0 %v706_v58 }
 0x264   : > { %1516 = vpow2.f32 %v605_v60 }
 0x269   : > { %v1515_v61 = vpop.eup %1514  ;;  %v609_v62 = vpop.xlane.xlu2 %608 }
 0x26a   : > { %v709_v63 = vsel %vm594_vm1, %v1515_v61, 0.0  ;;  %v1517_v1 = vpop.eup %1516 }
 0x26b   : > { %710 = vadd.xlane.f32.xlu1 %v709_v63  ;;  %v610_v3 = vsel %vm594_vm1, %v1517_v1, 0.0 }
 0x271   : > { %v719_v2 = vpop.permute.xlu2 %718 }
 0x272   : > { %731 = vmatpush.bf16.msrb.mxu2 %v719_v2 }
 0x273   : > { %611 = vadd.xlane.f32.xlu1 %v610_v3 }
 0x276   : > { %760 = vmatpush.bf16.msra.mxu2 %v1396_v6 }
 0x279   : > { %v773_v18 = vpop.permute.xlu2 %772 }
 0x27a   : > { %761 = vmatpush.bf16.msra.mxu2 %v1395_v9  ;;  %v778_v20 = vsel %vm573_vm0, %v773_v18, 0 }
 0x281   : > { %v870_v29 = vpop.permute.xlu2 %869 }
 0x28c   : > { %871 = vrot.lane.b32.xlu1 %v1966_v59, %s1781_s8 }
 0x294   : > { %770 = vrot.lane.b32.xlu1 %v1972_v0, %s1780_s27 }
 0x2d6   : > { %v708_v7 = vpop.xlane.xlu0 %707 }
 0x2d7   : > { %1518 = vrcp.f32 %v708_v7 }
 0x2dd   : > { %v1519_v10 = vpop.eup %1518 }
 0x2de   : > { %v711_v8 = vpop.xlane.xlu1 %710  ;;  %v714_v12 = vmul.f32 %v1519_v10, %v1513_v55 }
 0x2df   : > { %1520 = vrcp.f32 %v711_v8 }
 0x2e0   : > { %1522 = vrcp.f32 %v609_v62 }
 0x2e5   : > { %v1521_v11 = vpop.eup %1520 }
 0x2e6   : > { %v715_v59 = vmul.f32 %v1521_v11, %v1515_v61  ;;  %v612_v13 = vpop.xlane.xlu1 %611  ;;  %v1523_v14 = vpop.eup %1522 }
 0x2e7   : > { %1524 = vrcp.f32 %v612_v13  ;;  %v615_v16 = vmul.f32 %v1523_v14, %v1511_v45 }
 0x2e8   : > { %v716_v0 = vpack.c.bf16 %v715_v59, %v714_v12 }
 0x2ea   : > { %1301 = vmatmul.msk.bf16.vlgmr.msrb.gmra.mxu2 %vm594_vm1, %v716_v0 }
 0x2ed   : > { %v1525_v15 = vpop.eup %1524 }
 0x2ee   : > { %v616_v17 = vmul.f32 %v1525_v15, %v1517_v1 }
 0x2f0   : > { %v617_v19 = vpack.c.bf16 %v616_v17, %v615_v16 }
 0x2f2   : > { %1290 = vmatmul.msk.bf16.vlgmr.msrb.gmra.mxu3 %vm594_vm1, %v617_v19 }
 0x2f3   : > { %787 = vmatpush.bf16.xpose.msrb.mxu3 %v778_v20 }
 0x2fe   : > { %v872_v21 = vpop.permute.xlu1 %871 }
 0x2ff   : > { %v877_v22 = vsel %vm573_vm0, %v872_v21, 0 }
 0x300   : > { %886 = vmatpush.bf16.xpose.msrb.mxu2 %v877_v22  ;;  %v1400_v22 = vld [vmem:[#allocation8 + $0x38] sm:$0xff] }
 0x306   : > { %v771_v30 = vpop.permute.xlu1 %770 }
 0x36d   : > { %v733_v23 = vpop.f32.mrf.mxu2 }
 0x375   : > { %v631_v24 = vpop.f32.mrf.mxu3  ;;  %v735_v25 = vpop.f32.mrf.mxu2 }
 0x376   : > { %v738_v26 = vpack.c.bf16 %v735_v25, %v733_v23  ;;  %v1399_v23 = vld [vmem:[#allocation8 + $0x30] sm:$0xff]  ;;  %v1397_v25 = vld [vmem:[#allocation8 + $0x20] sm:$0xff] }
 0x378   : > { %1310 = vmatmul.msk.bf16.vlgmr.msra.gmra.mxu2 %vm573_vm0, %v738_v26  ;;  %v1408_v26 = vld [vmem:[#allocation10 + $0x38] sm:$0xff] }
 0x37d   : > { %v633_v27 = vpop.f32.mrf.mxu3 }
 0x37e   : > { %v636_v28 = vpack.c.bf16 %v633_v27, %v631_v24  ;;  %v1398_v24 = vld [vmem:[#allocation8 + $0x28] sm:$0xff]  ;;  %v1407_v27 = vld [vmem:[#allocation10 + $0x30] sm:$0xff] }
 0x37f   : > { %859 = vmatpush.bf16.msrb.mxu1 %v1398_v24 }
 0x380   : > { %1299 = vmatmul.msk.bf16.vlgmr.msra.gmra.mxu3 %vm573_vm0, %v636_v28  ;;  %v1406_v28 = vld [vmem:[#allocation10 + $0x28] sm:$0xff] }
 0x383   : > { %860 = vmatpush.bf16.msrb.mxu1 %v1397_v25 }
 0x387   : > { %1033 = vmatpush.bf16.msra.mxu1 %v1408_v26 }
 0x388   : > { %1322 = vmatmul.msk.bf16.vlgmr.msrb.gmra.mxu2 %vm573_vm0, %v870_v29 }
 0x38b   : > { %1034 = vmatpush.bf16.msra.mxu1 %v1407_v27 }
 0x38f   : > { %1035 = vmatpush.bf16.msra.mxu1 %v1406_v28 }
 0x390   : > { %1311 = vmatmul.msk.bf16.vlgmr.msrb.gmra.mxu3 %vm573_vm0, %v771_v30 }
 0x3fb   : > { %v763_v31 = vpop.f32.mrf.mxu2 }
 0x403   : > { %v661_v34 = vpop.f32.mrf.mxu3  ;;  %v765_v35 = vpop.f32.mrf.mxu2 }
 0x404   : > { %v666_v36 = vadd.f32 %v661_v34, %v569_v33 }
 0x406   : > { %v2014_v37 = vadd.f32 %v763_v31, %v666_v36  ;;  %v1404_v36 = vld [vmem:[#allocation10 + $0x18] sm:$0xff] }
 0x40b   : > { %v663_v39 = vpop.f32.mrf.mxu3  ;;  %v888_v40 = vpop.f32.mrf.mxu2 }
 0x40c   : > { %v667_v41 = vadd.f32 %v663_v39, %v570_v38  ;;  %v893_v42 = vsel %vm594_vm1, %v888_v40, -inf  ;;  %v1403_v38 = vld [vmem:[#allocation10 + $0x10] sm:$0xff]  ;;  %v1402_v39 = vld [vmem:[#allocation10 + $0x8] sm:$0xff] }
 0x40d   : > { %894 = vmax.xlane.f32.xlu0 %v893_v42 }
 0x40e   : > { %v2018_v43 = vadd.f32 %v765_v35, %v667_v41  ;;  %v1405_v35 = vld [vmem:[#allocation10 + $0x20] sm:$0xff] }
 0x40f   : > { %1036 = vmatpush.bf16.msra.mxu1 %v1405_v35 }
 0x413   : > { %v789_v45 = vpop.f32.mrf.mxu3  ;;  %v890_v46 = vpop.f32.mrf.mxu2  ;;  %1037 = vmatpush.bf16.msra.mxu1 %v1404_v36 }
 0x414   : > { %v794_v49 = vsel %vm594_vm1, %v789_v45, -inf  ;;  %v896_v47 = vsel %vm594_vm1, %v890_v46, -inf }
 0x415   : > { %795 = vmax.xlane.f32.xlu1 %v794_v49  ;;  %897 = vmax.xlane.f32.xlu2 %v896_v47 }
 0x417   : > { %1038 = vmatpush.bf16.msra.mxu1 %v1403_v38 }
 0x41b   : > { %v791_v50 = vpop.f32.mrf.mxu3  ;;  %1039 = vmatpush.bf16.msra.mxu1 %v1402_v39 }
 0x41c   : > { %v797_v51 = vsel %vm594_vm1, %v791_v50, -inf }
 0x41d   : > { %798 = vmax.xlane.f32.xlu0 %v797_v51 }
 0x42d   : > { %916 = vrot.lane.b32.xlu2 %v1985_v44, %s1781_s8 }
 0x480   : > { %v895_v48 = vpop.xlane.xlu0 %894 }
 0x481   : > { %v899_v61 = vsub.f32 %v888_v40, %v895_v48  ;;  %v1401_v40 = vld [vmem:[#allocation10] sm:$0xff] }
 0x482   : > { %1040 = vmatpush.bf16.msra.mxu1 %v1401_v40 }
 0x483   : > { %v901_v1 = vmul.f32 1.442695, %v899_v61 }
 0x488   : > { %v796_v52 = vpop.xlane.xlu1 %795  ;;  %v898_v53 = vpop.xlane.xlu2 %897 }
 0x489   : > { %v800_v54 = vsub.f32 %v789_v45, %v796_v52  ;;  %v900_v3 = vsub.f32 %v890_v46, %v898_v53 }
 0x48b   : > { %v802_v55 = vmul.f32 1.442695, %v800_v54  ;;  %v903_v5 = vmul.f32 1.442695, %v900_v3 }
 0x48d   : > { %1526 = vpow2.f32 %v802_v55 }
 0x490   : > { %v799_v56 = vpop.xlane.xlu0 %798  ;;  %v917_v57 = vpop.permute.xlu2 %916 }
 0x491   : > { %v801_v58 = vsub.f32 %v791_v50, %v799_v56  ;;  %929 = vmatpush.bf16.msra.mxu3 %v917_v57 }
 0x493   : > { %v1527_v60 = vpop.eup %1526  ;;  %v804_v62 = vmul.f32 1.442695, %v801_v58 }
 0x494   : > { %v806_v63 = vsel %vm594_vm1, %v1527_v60, 0.0 }
 0x495   : > { %1528 = vpow2.f32 %v804_v62  ;;  %807 = vadd.xlane.f32.xlu0 %v806_v63 }
 0x496   : > { %1530 = vpow2.f32 %v901_v1 }
 0x497   : > { %1532 = vpow2.f32 %v903_v5 }
 0x49b   : > { %v1529_v2 = vpop.eup %1528 }
 0x49c   : > { %v809_v4 = vsel %vm594_vm1, %v1529_v2, 0.0  ;;  %v1531_v6 = vpop.eup %1530 }
 0x49d   : > { %810 = vadd.xlane.f32.xlu0 %v809_v4  ;;  %v905_v7 = vsel %vm594_vm1, %v1531_v6, 0.0  ;;  %v1533_v8 = vpop.eup %1532 }
 0x49e   : > { %v908_v9 = vsel %vm594_vm1, %v1533_v8, 0.0 }
 0x4a5   : > { %906 = vadd.xlane.f32.xlu0 %v905_v7 }
 0x4ad   : > { %909 = vadd.xlane.f32.xlu0 %v908_v9 }
 0x4c1   : > { %817 = vrot.lane.b32.xlu0 %v1985_v44, %s1780_s27 }
 0x508   : > { %v808_v10 = vpop.xlane.xlu0 %807 }
 0x510   : > { %v811_v11 = vpop.xlane.xlu0 %810 }
 0x518   : > { %v907_v12 = vpop.xlane.xlu0 %906 }
 0x519   : > { %1534 = vrcp.f32 %v907_v12 }
 0x51f   : > { %v1535_v13 = vpop.eup %1534 }
 0x520   : > { %v910_v59 = vpop.xlane.xlu0 %909  ;;  %v913_v14 = vmul.f32 %v1535_v13, %v1531_v6 }
 0x521   : > { %1536 = vrcp.f32 %v910_v59 }
 0x522   : > { %1538 = vrcp.f32 %v811_v11 }
 0x523   : > { %1540 = vrcp.f32 %v808_v10 }
 0x527   : > { %v1537_v0 = vpop.eup %1536 }
 0x528   : > { %v914_v15 = vmul.f32 %v1537_v0, %v1533_v8  ;;  %v1539_v17 = vpop.eup %1538 }
 0x529   : > { %v1541_v18 = vpop.eup %1540  ;;  %v815_v19 = vmul.f32 %v1539_v17, %v1529_v2 }
 0x52a   : > { %v915_v16 = vpack.c.bf16 %v914_v15, %v913_v14  ;;  %v814_v20 = vmul.f32 %v1541_v18, %v1527_v60 }
 0x52c   : > { %1323 = vmatmul.msk.bf16.vlgmr.msra.gmra.mxu3 %vm594_vm1, %v915_v16  ;;  %v816_v21 = vpack.c.bf16 %v815_v19, %v814_v20 }
 0x533   : > { %v818_v44 = vpop.permute.xlu0 %817 }
 0x534   : > { %830 = vmatpush.bf16.msra.mxu0 %v818_v44 }
 0x537   : > { %1312 = vmatmul.msk.bf16.vlgmr.msra.gmra.mxu0 %vm594_vm1, %v816_v21 }
 0x538   : > { %958 = vmatpush.bf16.msrb.mxu0 %v1400_v22 }
 0x53c   : > { %959 = vmatpush.bf16.msrb.mxu0 %v1399_v23 }
 0x5af   : > { %v931_v29 = vpop.f32.mrf.mxu3 }
 0x5b4   : > { %v832_v30 = vpop.f32.mrf.mxu0 }
 0x5b7   : > { %v933_v31 = vpop.f32.mrf.mxu3 }
 0x5b8   : > { %v936_v32 = vpack.c.bf16 %v933_v31, %v931_v29 }
 0x5ba   : > { %1332 = vmatmul.msk.bf16.vlgmr.msrb.gmra.mxu0 %vm573_vm0, %v936_v32 }
 0x5bc   : > { %v834_v33 = vpop.f32.mrf.mxu0 }
 0x5bd   : > { %v837_v34 = vpack.c.bf16 %v834_v33, %v832_v30 }
 0x5bf   : > { %1321 = vmatmul.msk.bf16.vlgmr.msrb.gmra.mxu1 %vm573_vm0, %v837_v34 }
 0x637   : > { %v961_v41 = vpop.f32.mrf.mxu0 }
 0x63c   : > { %v862_v42 = vpop.f32.mrf.mxu1 }
 0x63d   : > { %v867_v45 = vadd.f32 %v862_v42, %v2014_v37 }
 0x63f   : > { %v963_v47 = vpop.f32.mrf.mxu0  ;;  %v966_v50 = vadd.f32 %v961_v41, %v867_v45 }
 0x644   : > { %v864_v46 = vpop.f32.mrf.mxu1 }
 0x645   : > { %v868_v49 = vadd.f32 %v864_v46, %v2018_v43 }
 0x647   : > { %v967_v51 = vadd.f32 %v963_v47, %v868_v49 }
 0x649   : > { %v968_v48 = vpack.c.bf16 %v967_v51, %v966_v50 }
 0x64b   : > { %1041 = vmatmul.bf16.vlgmr.msra.gmra.mxu1 %v968_v48 }
 0x6c8   : > { %v1042_v52 = vpop.f32.mrf.mxu1 }
 0x6c9   : > { %v1047_v53 = vadd.f32 %v1042_v52, %v966_v50 }
 0x6cb   : > { %1049 = vst [vmem:[%s334_s9] sm:$0xff] %v1047_v53 }
 0x6d0   : > { %v1044_v37 = vpop.f32.mrf.mxu1 }
 0x6d1   : > { %v1048_v43 = vadd.f32 %v1044_v37, %v967_v51 }
 0x6d3   : > { %1050 = vst [vmem:[%s334_s9 + $0x8] sm:$0xff] %v1048_v43 }
 0x6d4   : > { %1719 = shalt.err (!%p1716_p10)
}
 0x6d5   : > { %s1782_s19 = smov 128   ;;  %s1783_s13 = smov 256  }
 0x6d6   : > { %s1784_s14 = smov 8  }
 0x6d7   : > { %1427 = dma.vmem_to_hbm [thread:$0]  (%p1904_p3), %s1064_s30, 256, %s1066_s10, %s1052_s18, %s1782_s19, %s1783_s13, %s1784_s14  }
 0x6d8 PF: > { %s1080_s15 = sand.u32 1, %s1754_s21   ;;  %p2087_p12 = scmp.ge.s32.totalorder %s1766_s24, 2 }
 0x6d9   : > { %s1081_s20 = scalar_lea.sflag [#allocation4], %s1080_s15 }
 0x6da   : > { %p1447_p13 = pnand %p2087_p12, %p1855_p6 }
 0x6dc   : > { %p1448_p0 = pneg %p1447_p13 }
 0x6de   : > { %1749 = dma.done.wait (%p1448_p0), %s1081_s20, 256  }
 0x6df   : > { %1751 = vsyncadd (%p1448_p0), %s1081_s20, 4294967040  ;;  %p21_p5 = scmp.ge.s32.totalorder %s1894_s16, 4   ;;  %s2088_s21 = smov %s1758_s22 }
 0x6e0   : > { %s2089_s22 = smov %s1762_s23  ;;  %s2090_s23 = smov %s1910_s29 }
 0x6e1   : > { %s2091_s24 = smov %s1894_s16  ;;  %23 = sbr.rel (!%p21_p5) target bundleno = 9 (0x9), region = 105 }
 0x6e6   :  { %1087 = vsyncpa [#allocation3], 1 }
 0x6e7   :  { %1089 = vsyncpa [#allocation3 + $0x1], 1 }
 0x6e8   :  { %1090 = vsyncpa [#allocation6], 1 }
 0x6e9   :  { %1091 = vsyncpa [#allocation9], 1 }
 0x6ea   :  { %1092 = vsyncpa [#allocation4], 1 }
 0x6eb   :  { %1094 = vsyncpa [#allocation4 + $0x1], 1 }

</bundles_post_ra>
